<compile_context>
chip_gen: v5e
topology: v5e:2x2
jax: 0.10.0
libtpu: 0.0.40
codegen_flags: <defaults>
</compile_context>

<pallas_src>
import math

import jax
import jax.numpy as jnp
from jax.experimental import pallas as pl
from jax.experimental.pallas import tpu as pltpu

_MiB = 1024 * 1024


def make_pe_table(max_length: int, d_model: int, dtype=jnp.float32) -> jnp.ndarray:
    """Sinusoidal PE buffer, shape (max_length, d_model), in the given dtype.

    Build this once per activation dtype and reuse it across forward calls
    (it plays the role of the PyTorch registered buffer).
    """
    position = jnp.arange(max_length, dtype=jnp.float32)[:, None]            # (L, 1)
    div_term = jnp.exp(
        jnp.arange(0, d_model, 2, dtype=jnp.float32)
        * (-math.log(10000.0) / d_model)
    )                                                                         # (ceil(D/2),)
    angles = position * div_term                                              # (L, ceil(D/2))
    pe = jnp.zeros((max_length, d_model), dtype=jnp.float32)
    pe = pe.at[:, 0::2].set(jnp.sin(angles))
    pe = pe.at[:, 1::2].set(jnp.cos(angles[:, : d_model // 2]))               # odd-D guard
    return pe.astype(dtype)


def _pe_add_kernel(x_ref, pe_ref, o_ref):
    # x_ref: (TS, TB, D); pe_ref: (TS, D) -> broadcast over the batch axis.
    o_ref[...] = x_ref[...] + pe_ref[...][:, None, :]


def _round_down(x: int, m: int) -> int:
    return (x // m) * m


def _choose_tiles(seq_len: int, batch: int, d_model: int, itemsize: int):
    """Generation-aware (seq_tile, batch_tile, vmem_capacity) heuristic."""
    try:
        vmem_cap = int(pltpu.get_tpu_info().vmem_capacity_bytes)
    except Exception:  # interpret mode / unknown chip
        vmem_cap = 64 * _MiB

    if vmem_cap >= 96 * _MiB:
        # v5e / v6e: 128 MiB physical VMEM -> larger blocks amortize per-step
        # overhead; ~8 MiB activation blocks sit on the ~86% roofline plateau.
        target_block_bytes = 8 * _MiB
    else:
        # v7x: 64 MiB physical VMEM (32 MiB scoped default) and faster HBM ->
        # keep the double-buffered footprint well under ~28 MiB.
        target_block_bytes = 4 * _MiB

    row_bytes = batch * d_model * itemsize
    if row_bytes <= target_block_bytes:
        batch_tile = batch
        seq_tile = max(8, _round_down(target_block_bytes // row_bytes, 8))
    else:
        # One seq row alone exceeds the block budget -> tile the batch axis too.
        seq_tile = 8
        per_row = seq_tile * d_model * itemsize
        batch_tile = max(8, _round_down(target_block_bytes // per_row, 8))
        batch_tile = min(batch_tile, _round_down(batch, 8)) if batch >= 8 else batch

    # Never use a seq tile larger than the (8-aligned) sequence itself.
    if seq_len >= 8:
        seq_tile = min(seq_tile, _round_down(seq_len, 8))
    else:
        seq_tile = seq_len  # degenerate tiny-sequence path (single full block)
    return seq_tile, batch_tile, vmem_cap


def positional_encoding_forward(
    x: jnp.ndarray,
    pe_table: jnp.ndarray,
    *,
    seq_tile: int | None = None,
    batch_tile: int | None = None,
) -> jnp.ndarray:
    """x: (seq_len, batch, d_model); pe_table: (max_length, d_model)."""
    seq_len, batch, d_model = x.shape
    max_length, pe_d = pe_table.shape
    if pe_d != d_model:
        raise ValueError(f"pe_table d_model={pe_d} != x d_model={d_model}")
    if seq_len > max_length:
        raise ValueError(
            f"seq_len={seq_len} exceeds positional-encoding max_length={max_length}"
        )
    if pe_table.dtype != x.dtype:
        # One-off cast (callers should cache the table per activation dtype to
        # avoid this extra HBM pass on every forward call).
        pe_table = pe_table.astype(x.dtype)

    itemsize = jnp.dtype(x.dtype).itemsize
    auto_seq, auto_batch, vmem_cap = _choose_tiles(seq_len, batch, d_model, itemsize)
    if seq_tile is None:
        seq_tile = auto_seq
    if batch_tile is None:
        batch_tile = auto_batch
    seq_tile = int(min(seq_tile, seq_len))
    batch_tile = int(min(batch_tile, batch))

    if seq_tile % 8 == 0 and seq_tile > 0:
        # Main path: index_map slices the full PE table (no wrapper-side slice,
        # so no extra HBM read/write pass). (seq_tile, d_model) is tile-dense.
        pe_in = pe_table
    else:
        # Degenerate tiny/odd sequence path: single full-extent block over a
        # pre-sliced table so the (8, 128) block constraint is waived.
        seq_tile = seq_len
        pe_in = pe_table[:seq_len]

    grid = (pl.cdiv(seq_len, seq_tile), pl.cdiv(batch, batch_tile))

    # Double-buffered footprint: 2x(x_blk + out_blk) + 2x pe_blk, plus slack.
    x_blk_bytes = seq_tile * batch_tile * d_model * itemsize
    pe_blk_bytes = seq_tile * d_model * itemsize
    footprint = 2 * (2 * x_blk_bytes) + 2 * pe_blk_bytes
    vmem_limit = int(min(vmem_cap, max(32 * _MiB, footprint + 4 * _MiB)))

    return pl.pallas_call(
        _pe_add_kernel,
        out_shape=jax.ShapeDtypeStruct((seq_len, batch, d_model), x.dtype),
        grid=grid,
        in_specs=[
            # x: last two block dims are (batch_tile, d_model) — full batch in
            # the common path, D stays lane-dense.
            pl.BlockSpec((seq_tile, batch_tile, d_model), lambda i, j: (i, j, 0)),
            # pe: same seq block for every batch block; sliced out of the full
            # (max_length, d_model) table by the index_map.
            pl.BlockSpec((seq_tile, d_model), lambda i, j: (i, 0)),
        ],
        out_specs=pl.BlockSpec((seq_tile, batch_tile, d_model), lambda i, j: (i, j, 0)),
        compiler_params=pltpu.CompilerParams(
            # Every (seq, batch) tile is independent -> shard across v7x's 2 TCs.
            dimension_semantics=("parallel", "parallel"),
            vmem_limit_bytes=vmem_limit,
        ),
    )(x, pe_in)


if __name__ == "__main__":
    # Small but lane-dense test shapes (d_model multiple of 128).
    d_model = 128
    max_length = 256   # module default is 4096; small table for the test
    seq_len = 64
    batch = 2

    key = jax.random.PRNGKey(0)
    x = jax.random.normal(key, (seq_len, batch, d_model), dtype=jnp.float32)

    # PE buffers cached per activation dtype (hoisted out of the forward path).
    pe_f32 = make_pe_table(max_length, d_model, jnp.float32)
    pe_bf16 = make_pe_table(max_length, d_model, jnp.bfloat16)

    # Reference (eval-mode dropout == identity).
    ref = x + pe_f32[:seq_len][:, None, :]

    # Force a small seq tile so the test exercises a multi-step pipelined grid.
    out = positional_encoding_forward(x, pe_f32, seq_tile=16)
    out = jax.block_until_ready(out)
    assert out.shape == (seq_len, batch, d_model)
    assert jnp.allclose(out, ref, atol=1e-6), "f32 mismatch vs reference"

    # Auto-tiled path (single big block at these tiny shapes).
    out_auto = jax.block_until_ready(positional_encoding_forward(x, pe_f32))
    assert jnp.allclose(out_auto, ref, atol=1e-6), "auto-tile mismatch vs reference"

    # bf16 path: halves HBM traffic for this purely bandwidth-bound kernel.
    x_bf16 = x.astype(jnp.bfloat16)
    ref_bf16 = x_bf16 + pe_bf16[:seq_len][:, None, :]
    out_bf16 = positional_encoding_forward(x_bf16, pe_bf16, seq_tile=16)
    out_bf16 = jax.block_until_ready(out_bf16)
    assert out_bf16.dtype == jnp.bfloat16
    assert jnp.allclose(
        out_bf16.astype(jnp.float32), ref_bf16.astype(jnp.float32), atol=1e-2
    ), "bf16 mismatch vs reference"

    print("KERNEL_OK")
</pallas_src>

<mosaic_0001>
module attributes {stable_mosaic.version = 11 : i64} {
  func.func @_pe_add_kernel(%arg0: i32, %arg1: i32, %arg2: memref<16x2x128xf32, #tpu.memory_space<vmem>>, %arg3: memref<16x128xf32, #tpu.memory_space<vmem>>, %arg4: memref<16x2x128xf32, #tpu.memory_space<vmem>>) attributes {dimension_semantics = [#tpu.dimension_semantics<parallel>, #tpu.dimension_semantics<parallel>], iteration_bounds = array<i64: 4, 1>, scalar_prefetch = 0 : i64, scratch_operands = 0 : i64, tpu.core_type = #tpu.core_type<tc>, window_params = [{transform_indices = @transform_0, window_bounds = array<i64: 16, 2, 128>}, {transform_indices = @transform_1, window_bounds = array<i64: 16, 128>}, {transform_indices = @transform_2, window_bounds = array<i64: 16, 2, 128>}]} {
    %c0 = arith.constant 0 : index
    %c0_0 = arith.constant 0 : index
    %c0_1 = arith.constant 0 : index
    %0 = vector.load %arg2[%c0, %c0_0, %c0_1] : memref<16x2x128xf32, #tpu.memory_space<vmem>>, vector<16x2x128xf32>
    %c0_2 = arith.constant 0 : index
    %c0_3 = arith.constant 0 : index
    %1 = vector.load %arg3[%c0_2, %c0_3] : memref<16x128xf32, #tpu.memory_space<vmem>>, vector<16x128xf32>
    %2 = vector.shape_cast %1 : vector<16x128xf32> to vector<16x1x128xf32>
    %3 = vector.broadcast %2 : vector<16x1x128xf32> to vector<16x2x128xf32>
    %4 = arith.addf %0, %3 : vector<16x2x128xf32>
    %c0_4 = arith.constant 0 : index
    %c0_5 = arith.constant 0 : index
    %c0_6 = arith.constant 0 : index
    %5 = vector.load %arg4[%c0_4, %c0_5, %c0_6] : memref<16x2x128xf32, #tpu.memory_space<vmem>>, vector<16x2x128xf32>
    tpu.vector_store %arg4[%c0_4, %c0_5, %c0_6], %4 {strides = array<i32>} : memref<16x2x128xf32, #tpu.memory_space<vmem>>, vector<16x2x128xf32>,
    return
  }
  func.func @transform_0(%arg0: i32, %arg1: i32) -> (i32, i32, i32) {
    %c0_i32 = arith.constant 0 : i32
    %c0_i32_0 = arith.constant 0 : i32
    return %arg0, %arg1, %c0_i32 : i32, i32, i32
  }
  func.func @transform_1(%arg0: i32, %arg1: i32) -> (i32, i32) {
    %c0_i32 = arith.constant 0 : i32
    %c0_i32_0 = arith.constant 0 : i32
    return %arg0, %c0_i32 : i32, i32
  }
  func.func @transform_2(%arg0: i32, %arg1: i32) -> (i32, i32, i32) {
    %c0_i32 = arith.constant 0 : i32
    %c0_i32_0 = arith.constant 0 : i32
    return %arg0, %arg1, %c0_i32 : i32, i32, i32
  }
}

</mosaic_0001>

<bundles_post_ra>
// kernel: tpu_custom_call.1
= control target key start
LH: loop header
LB: loop body
LE: loop exit
PB: predicated region body
PF: predicated region fallthrough
CT: control target
= control target key end

     0   :  { %s898_s0 = inlined_call_operand.hbm [shape: f32[64,2,128], index: 0, kind: input, shape index: {}]   ;;  %s899_s1 = inlined_call_operand.hbm [shape: f32[256,128], index: 1, kind: input, shape index: {}]   ;;  %s900_s2 = inlined_call_operand.hbm [shape: f32[64,2,128], index: 2, kind: output, shape index: {}]  }
   0x1   :  { %901 = sst [smem:[#allocation11_spill]] %s898_s0 }
   0x2   :  { %7 = vsyncpa [#allocation3], 0 }
   0x3   :  { %9 = vsyncpa [#allocation3 + $0x1], 0 }
   0x4   :  { %10 = vsyncpa [#allocation6], 0 }
   0x5   :  { %12 = vsyncpa [#allocation6 + $0x1], 0 }
   0x6   :  { %13 = vsyncpa [#allocation4], 0 }
   0x7   :  { %15 = vsyncpa [#allocation4 + $0x1], 0  ;;  %s713_s9 = smov 0   ;;  %s715_s10 = smov 0  }
   0x8   :  { %s717_s11 = smov 0   ;;  %s719_s12 = smov 0  }
   0x9   :  { %s721_s13 = smov 0   ;;  %s723_s14 = smov 0  }
   0xa LB: > { %s449_s15 = sadd.s32 4294967295, %s690_s14   ;;  %s450_s16 = sadd.s32 4294967294, %s690_s14   ;;  %s690_s14 = sphi %s723_s14, %s21_s14   ;;  %s686_s13 = sphi %s721_s13, %s912_s13   ;;  %s682_s12 = sphi %s719_s12, %s911_s12   ;;  %s678_s11 = sphi %s717_s11, %s910_s11   ;;  %s674_s10 = sphi %s715_s10, %s909_s10   ;;  %s670_s9 = sphi %s713_s9, %s908_s9  }
   0xb   : > { %s33_s17 = sadd.s32 1, %s686_s13  ;;  %s42_s18 = sadd.s32 1, %s678_s11 }
   0xc   : > { %p35_p0 = scmp.ge.s32.totalorder %s33_s17, 4  ;;  %p49_p1 = scmp.ne.s32.totalorder %s678_s11, %s674_s10 }
   0xd   : > { %p50_p2 = scmp.eq.s32.totalorder %s690_s14, 0  ;;  %p55_p3 = scmp.ne.s32.totalorder %s674_s10, %s670_s9 }
   0xe   : > { %s914_s17 = smov (%p35_p0, %s33_s17), 0  ;;  %p56_p5 = scmp.eq.s32.totalorder %s449_s15, 0 }
   0xf   : > { %p754_p4 = por %p50_p2, %p49_p1  ;;  %s37_s20 = ssub.s32 %s686_s13, %s914_s17 }
  0x10   : > { %p107_p6 = scmp.eq.s32.totalorder %s449_s15, 3  ;;  %p40_p7 = scmp.eq.s32.totalorder %s37_s20, 0 }
  0x11   : > { %p760_p8 = por %p56_p5, %p55_p3  ;;  %p113_p10 = scmp.eq.s32.totalorder %s450_s16, 3 }
  0x12   : > { %p764_p9 = por %p107_p6, %p49_p1  ;;  %p488_p12 = scmp.lt.s32.totalorder %s690_s14, 4 }
  0x13   : > { %s769_s23 = scalar_select %p40_p7, %s678_s11, %s42_s18  }
  0x14   : > { %p771_p11 = por %p113_p10, %p55_p3  ;;  %s777_s25 = sand.u32 1, %s678_s11  }
  0x15   : > { %s453_s26 = sshll.u32 %s777_s25, 5  ;;  %s468_s27 = sshll.u32 %s686_s13, 5 }
  0x16   : > { %s906_s0 = sld [smem:[#allocation11_spill]]  ;;  %s137_s3 = scalar_lea.vmem [#allocation2], %s453_s26 }
  0x17   : > { %s146_s4 = sshll.u32 %s137_s3, 4  ;;  %p786_p13 = pnand %p488_p12, %p754_p4  ;;  %s147_s4 = int_to_ptr.vmem [resolvable:$true] %s146_s4 }
  0x18   : > { %p459_p0 = scmp.ge.s32.totalorder %s690_s14, 1  ;;  %s134_s7 = scalar_lea.sflag [#allocation3], %s777_s25 }
  0x19   : > { %s692_s8 = smov 32   ;;  %s693_s15 = smov 2  }
  0x1a   : > { %p176_p1 = scmp.lt.s32.totalorder %s690_s14, 5  ;;  %s456_s16 = sshll.u32 %s777_s25, 4 }
  0x1b   : > { %s469_s18 = sshll.u32 %s686_s13, 4  ;;  %s694_s3 = smov 128  }
  0x1c   : > { %s143_s30 = scalar_lea.hbm %s906_s0, %s468_s27  ;;  %p177_p2 = pnand %p459_p0, %p176_p1 }
  0x1d   : > { %s144_s5 = sshll.u32 %s143_s30, 4  ;;  %s165_s19 = scalar_lea.hbm %s899_s1, %s469_s18  ;;  %s145_s5 = int_to_ptr.hbm [resolvable:$true] %s144_s5 }
  0x1e   : > { %480 = dma.hbm_to_vmem [thread:$0]  (!%p786_p13), %s145_s5, 512, %s147_s4, %s134_s7, %s692_s8, %s692_s8, %s693_s15  }
  0x1f   : > { %s160_s27 = scalar_lea.vmem [#allocation5], %s456_s16  ;;  %s166_s29 = sshll.u32 %s165_s19, 4  ;;  %s167_s29 = int_to_ptr.hbm [resolvable:$true] %s166_s29 }
  0x20   : > { %s168_s28 = sshll.u32 %s160_s27, 4  ;;  %s157_s30 = scalar_lea.sflag [#allocation6], %s777_s25  ;;  %s169_s28 = int_to_ptr.vmem [resolvable:$true] %s168_s28 }
  0x21   : > { %s695_s0 = smov 8   ;;  %180 = sbr.rel (%p177_p2) target bundleno = 68 (0x44), region = 28 }
  0x22   : > { %483 = dma.hbm_to_vmem [thread:$0]  (!%p786_p13), %s167_s29, 256, %s169_s28, %s157_s30, %s694_s3, %s694_s3, %s695_s0  }
  0x23   : > { %s804_s4 = sand.u32 (!%p177_p2), 1, %s674_s10  }
  0x24   : > { %s460_s5 = sshll.u32 (!%p177_p2), %s804_s4, 5  ;;  %s183_s7 = scalar_lea.sflag (!%p177_p2), [#allocation3], %s804_s4 }
  0x25   : > { %s810_s8 = scalar_lea.vmem (!%p177_p2), [#allocation2], %s460_s5 }
  0x26   : > { %657 = dma.done.wait (%p760_p8), %s183_s7, 512  }
  0x27   : > { %659 = vsyncadd (%p760_p8), %s183_s7, 4294966784  ;;  %s461_s0 = sshll.u32 %s804_s4, 4  ;;  %s193_s25 = scalar_lea.sflag [#allocation6], %s804_s4 }
  0x28   : > { %s196_s6 = scalar_lea.vmem [#allocation5], %s461_s0 }
  0x29   : > { %661 = dma.done.wait (%p760_p8), %s193_s25, 256  }
  0x2a   : > { %663 = vsyncadd (%p760_p8), %s193_s25, 4294967040  ;;  %v226_v0 = vld [vmem:[%s810_s8] sm:$0x3]  ;;  %v227_v2 = vld [vmem:[%s810_s8 + $0x2] sm:$0x3]  ;;  %s830_s21 = scalar_lea.vmem [#allocation7], %s460_s5 }
  0x2b   : > { %v242_v1 = vld [vmem:[%s196_s6] sm:$0xff]  ;;  %v230_v9 = vld [vmem:[%s810_s8 + $0x8] sm:$0x3]  ;;  %v231_v16 = vld [vmem:[%s810_s8 + $0xa] sm:$0x3]  ;;  %s470_s15 = sshll.u32 %s682_s12, 5 }
  0x2c   : > { %v260_v3 = vperm.slane %v242_v1, 0  ;;  %v246_v4 = vrot.slane %v242_v1, 1  ;;  %v228_v5 = vld [vmem:[%s810_s8 + $0x4] sm:$0x3]  ;;  %v247_v6 = vrot.slane %v242_v1, 2  ;;  %v248_v7 = vrot.slane %v242_v1, 3  ;;  %s337_s20 = scalar_lea.hbm %s900_s2, %s470_s15 }
  0x2d   : > { %v229_v8 = vld [vmem:[%s810_s8 + $0x6] sm:$0x3]  ;;  %v249_v10 = vrot.slane %v242_v1, 4  ;;  %v250_v11 = vrot.slane %v242_v1, 5  ;;  %v251_v19 = vrot.slane %v242_v1, 6  ;;  %v252_v20 = vrot.slane %v242_v1, 7 }
  0x2e   : > { %v292_v12 = vadd.f32 %v260_v3, %v226_v0  ;;  %v261_v13 = vperm.slane %v246_v4, 0  ;;  %v262_v14 = vperm.slane %v247_v6, 0  ;;  %v263_v15 = vperm.slane %v248_v7, 0  ;;  %v243_v21 = vld [vmem:[%s196_s6 + $0x8] sm:$0xff]  ;;  %v234_v31 = vld [vmem:[%s810_s8 + $0x10] sm:$0x3] }
  0x2f   : > { %v264_v17 = vperm.slane %v249_v10, 0  ;;  %v265_v18 = vperm.slane %v250_v11, 0  ;;  %v232_v25 = vld [vmem:[%s810_s8 + $0xc] sm:$0x3]  ;;  %v268_v26 = vperm.slane %v243_v21, 0  ;;  %v266_v28 = vperm.slane %v251_v19, 0 }
  0x30   : > { %308 = vst [vmem:[%s830_s21] sm:$0x3] %v292_v12  ;;  %v293_v22 = vadd.f32 %v261_v13, %v227_v2  ;;  %v294_v23 = vadd.f32 %v262_v14, %v228_v5  ;;  %v295_v24 = vadd.f32 %v263_v15, %v229_v8  ;;  %v233_v29 = vld [vmem:[%s810_s8 + $0xe] sm:$0x3]  ;;  %v267_v30 = vperm.slane %v252_v20, 0  ;;  %v235_v33 = vld [vmem:[%s810_s8 + $0x12] sm:$0x3] }
  0x31   : > { %v296_v27 = vadd.f32 %v264_v17, %v230_v9  ;;  %v297_v32 = vadd.f32 %v265_v18, %v231_v16  ;;  %v253_v34 = vrot.slane %v243_v21, 1  ;;  %v254_v35 = vrot.slane %v243_v21, 2  ;;  %v236_v37 = vld [vmem:[%s810_s8 + $0x14] sm:$0x3]  ;;  %v237_v44 = vld [vmem:[%s810_s8 + $0x16] sm:$0x3] }
  0x32   : > { %309 = vst [vmem:[%s830_s21 + $0x2] sm:$0x3] %v293_v22  ;;  %v298_v36 = vadd.f32 %v266_v28, %v232_v25  ;;  %v255_v38 = vrot.slane %v243_v21, 3  ;;  %v256_v39 = vrot.slane %v243_v21, 4  ;;  %v299_v40 = vadd.f32 %v267_v30, %v233_v29  ;;  %v238_v50 = vld [vmem:[%s810_s8 + $0x18] sm:$0x3] }
  0x33   : > { %310 = vst [vmem:[%s830_s21 + $0x4] sm:$0x3] %v294_v23  ;;  %v300_v41 = vadd.f32 %v268_v26, %v234_v31  ;;  %v269_v42 = vperm.slane %v253_v34, 0  ;;  %v270_v43 = vperm.slane %v254_v35, 0  ;;  %v257_v47 = vrot.slane %v243_v21, 5  ;;  %s338_s26 = sshll.u32 %s830_s21, 4  ;;  %s339_s26 = int_to_ptr.vmem [resolvable:$true] %s338_s26 }
  0x34   : > { %311 = vst [vmem:[%s830_s21 + $0x6] sm:$0x3] %v295_v24  ;;  %v271_v45 = vperm.slane %v255_v38, 0  ;;  %v272_v46 = vperm.slane %v256_v39, 0  ;;  %v258_v48 = vrot.slane %v243_v21, 6  ;;  %v259_v57 = vrot.slane %v243_v21, 7 }
  0x35   : > { %312 = vst [vmem:[%s830_s21 + $0x8] sm:$0x3] %v296_v27  ;;  %v301_v49 = vadd.f32 %v269_v42, %v235_v33  ;;  %v302_v51 = vadd.f32 %v270_v43, %v236_v37  ;;  %v239_v52 = vld [vmem:[%s810_s8 + $0x1a] sm:$0x3]  ;;  %v273_v53 = vperm.slane %v257_v47, 0  ;;  %s340_s19 = sshll.u32 %s337_s20, 4  ;;  %s341_s19 = int_to_ptr.hbm [resolvable:$true] %s340_s19 }
  0x36   : > { %313 = vst [vmem:[%s830_s21 + $0xa] sm:$0x3] %v297_v32  ;;  %v274_v54 = vperm.slane %v258_v48, 0  ;;  %v303_v55 = vadd.f32 %v271_v45, %v237_v44  ;;  %v240_v56 = vld [vmem:[%s810_s8 + $0x1c] sm:$0x3]  ;;  %v304_v58 = vadd.f32 %v272_v46, %v238_v50  ;;  %v275_v61 = vperm.slane %v259_v57, 0 }
  0x37   : > { %314 = vst [vmem:[%s830_s21 + $0xc] sm:$0x3] %v298_v36  ;;  %v241_v59 = vld [vmem:[%s810_s8 + $0x1e] sm:$0x3]  ;;  %v305_v60 = vadd.f32 %v273_v53, %v239_v52  ;;  %s325_s12 = scalar_lea.sflag [#allocation4], %s804_s4  ;;  %s618_s27 = sshra.s32 %s341_s19, 4  ;;  %s619_s27 = int_to_ptr.hbm [resolvable:$true] %s618_s27 }
  0x38   : > { %315 = vst [vmem:[%s830_s21 + $0xe] sm:$0x3] %v299_v40  ;;  %v306_v62 = vadd.f32 %v274_v54, %v240_v56  ;;  %v307_v63 = vadd.f32 %v275_v61, %v241_v59  ;;  %s620_s28 = scalar_lea.hbm %s619_s27, 32  ;;  %s624_s3 = scalar_lea.hbm %s900_s2, 128 }
  0x39   : > { %316 = vst [vmem:[%s830_s21 + $0x10] sm:$0x3] %v300_v41  ;;  %p621_p3 = scmp.ne.s32.totalorder %s619_s27, %s620_s28  ;;  %p625_p6 = scmp.lt.s32.totalorder %s619_s27, %s900_s2 }
  0x3a   : > { %317 = vst [vmem:[%s830_s21 + $0x12] sm:$0x3] %v301_v49  ;;  %p626_p7 = scmp.lt.s32.totalorder %s624_s3, %s620_s28 }
  0x3b   : > { %318 = vst [vmem:[%s830_s21 + $0x14] sm:$0x3] %v302_v51  ;;  %p622_p4 = pnand %p621_p3, %p764_p9 }
  0x3c   : > { %319 = vst [vmem:[%s830_s21 + $0x16] sm:$0x3] %v303_v55  ;;  %p627_p8 = por %p626_p7, %p625_p6 }
  0x3d   : > { %320 = vst [vmem:[%s830_s21 + $0x18] sm:$0x3] %v304_v58  ;;  %p623_p5 = pneg %p622_p4 }
  0x3e   : > { %321 = vst [vmem:[%s830_s21 + $0x1a] sm:$0x3] %v305_v60 }
  0x3f   : > { %322 = vst [vmem:[%s830_s21 + $0x1c] sm:$0x3] %v306_v62  ;;  %p628_p10 = pnand %p627_p8, %p623_p5 }
  0x40   : > { %323 = vst [vmem:[%s830_s21 + $0x1e] sm:$0x3] %v307_v63 }
  0x41   : > { %631 = shalt.err (!%p628_p10)
}
  0x42   : > { %s696_s4 = smov 32   ;;  %s697_s8 = smov 2  }
  0x43   : > { %475 = dma.vmem_to_hbm [thread:$0]  (%p764_p9), %s339_s26, 512, %s341_s19, %s325_s12, %s696_s4, %s696_s4, %s697_s8  }
  0x44 PF: > { %p489_p12 = scmp.ge.s32.totalorder %s690_s14, 2  ;;  %s355_s0 = sand.u32 1, %s670_s9  }
  0x45   : > { %s356_s25 = scalar_lea.sflag [#allocation4], %s355_s0 }
  0x46   : > { %p485_p13 = pnand %p489_p12, %p771_p11 }
  0x48   : > { %p486_p0 = pneg %p485_p13 }
  0x4a   : > { %665 = dma.done.wait (%p486_p0), %s356_s25, 512  }
  0x4b   : > { %667 = vsyncadd (%p486_p0), %s356_s25, 4294966784  ;;  %s21_s14 = sadd.s32 1, %s690_s14   ;;  %s908_s9 = smov %s674_s10 }
  0x4c   : > { %p18_p1 = scmp.ge.s32.totalorder %s21_s14, 6   ;;  %s909_s10 = smov %s678_s11 }
  0x4d   : > { %s910_s11 = smov %s769_s23  ;;  %s911_s12 = smov %s686_s13 }
  0x4e   : > { %s912_s13 = smov %s914_s17  ;;  %20 = sbr.rel (!%p18_p1) target bundleno = 10 (0xa), region = 86 }
  0x53   :  { %362 = vsyncpa [#allocation3], 1 }
  0x54   :  { %364 = vsyncpa [#allocation3 + $0x1], 1 }
  0x55   :  { %365 = vsyncpa [#allocation6], 1 }
  0x56   :  { %367 = vsyncpa [#allocation6 + $0x1], 1 }
  0x57   :  { %368 = vsyncpa [#allocation4], 1 }
  0x58   :  { %370 = vsyncpa [#allocation4 + $0x1], 1 }

</bundles_post_ra>
